<compile_context>
chip_gen: v7x
topology: tpu7x:2x2x1
jax: 0.10.0
libtpu: 0.0.40
codegen_flags: <defaults>
</compile_context>

<pallas_src>
import functools
import math

import jax
import jax.numpy as jnp
from jax.experimental import pallas as pl
from jax.experimental.pallas import tpu as pltpu


def _round_up(n, m):
    return ((n + m - 1) // m) * m


def _fused_masked_rnn_kernel(h0_ref, x_ref, wih_ref, whh_ref, b_ref,
                             out_ref, h_scr):
    """One grid step == one timestep of the recurrence.

    h0_ref : (Bp, Hp)      initial hidden state (resident across the grid)
    x_ref  : (1, Bp, Ip)   features of timestep t
    wih_ref: (Ip, Hp)      (W_ih * mask_i2h).T, pre-masked + pre-transposed
    whh_ref: (Hp, Hp)      (W_hh * mask_h2h).T, pre-masked + pre-transposed
    b_ref  : (1, Hp)       b_ih + b_hh
    out_ref: (1, Bp, Hp)   hidden state emitted for timestep t
    h_scr  : (Bp, Hp)      VMEM scratch carrying the recurrent state
    """
    t = pl.program_id(0)

    @pl.when(t == 0)
    def _():
        h_scr[...] = h0_ref[...]

    x_t = x_ref[0]                                   # (Bp, Ip)
    igate = jnp.dot(x_t, wih_ref[...], preferred_element_type=jnp.float32)
    hgate = jnp.dot(h_scr[...], whh_ref[...], preferred_element_type=jnp.float32)
    h_new = jnp.tanh(igate + hgate + b_ref[...])     # (Bp, Hp), f32 epilogue

    h_scr[...] = h_new
    out_ref[0] = h_new.astype(out_ref.dtype)


def masked_rnn_unfold(x_seq, hx, w_ih, w_hh, mask_i2h, mask_h2h, b_ih, b_hh):
    """Fused unfold(): x_seq (seq, batch, input) -> (seq, batch, hidden).

    Entire sequence runs in a single pallas_call; weights/masks/biases are
    folded and kept resident in VMEM for all timesteps.
    """
    S, B, I = x_seq.shape
    H = w_ih.shape[0]

    # Fold static masks into the weights, pre-transpose to (in, out) layout,
    # and pre-sum the biases -- all one-time wrapper work, out of the hot loop.
    wih_t = (w_ih * mask_i2h.astype(w_ih.dtype)).T          # (I, H)
    whh_t = (w_hh * mask_h2h.astype(w_hh.dtype)).T          # (H, H)
    bias = (b_ih + b_hh).reshape(1, H)                      # (1, H)

    # Pad to TPU-friendly shapes: sublane multiple of 8, lane multiple of 128
    # (lane-dense output stores; unmasked MXU N dim).  Zero padding keeps the
    # real lanes exact: padded gates are 0 -> tanh(0) = 0 in padded lanes.
    Bp = _round_up(B, 8)
    Ip = _round_up(I, 128)
    Hp = _round_up(H, 128)

    x_p = jnp.pad(x_seq, ((0, 0), (0, Bp - B), (0, Ip - I)))
    h0_p = jnp.pad(hx, ((0, Bp - B), (0, Hp - H)))
    wih_p = jnp.pad(wih_t, ((0, Ip - I), (0, Hp - H)))
    whh_p = jnp.pad(whh_t, ((0, Hp - H), (0, Hp - H)))
    b_p = jnp.pad(bias, ((0, 0), (0, Hp - H)))

    out = pl.pallas_call(
        _fused_masked_rnn_kernel,
        out_shape=jax.ShapeDtypeStruct((S, Bp, Hp), jnp.float32),
        grid_spec=pltpu.PrefetchScalarGridSpec(
            num_scalar_prefetch=0,
            grid=(S,),
            in_specs=[
                pl.BlockSpec((Bp, Hp), lambda t: (0, 0)),       # h0 (resident)
                pl.BlockSpec((1, Bp, Ip), lambda t: (t, 0, 0)),  # x[t]
                pl.BlockSpec((Ip, Hp), lambda t: (0, 0)),       # W_ih^T (resident)
                pl.BlockSpec((Hp, Hp), lambda t: (0, 0)),       # W_hh^T (resident)
                pl.BlockSpec((1, Hp), lambda t: (0, 0)),        # bias (resident)
            ],
            out_specs=pl.BlockSpec((1, Bp, Hp), lambda t: (t, 0, 0)),
            scratch_shapes=[pltpu.VMEM((Bp, Hp), jnp.float32)],
        ),
        compiler_params=pltpu.CompilerParams(
            # The recurrence is strictly sequential in t.
            dimension_semantics=("arbitrary",)),
    )(h0_p, x_p, wih_p, whh_p, b_p)

    return out[:, :B, :H]


def masked_recurrent_layer_forward(x, hx, w_ih, w_hh, mask_i2h, mask_h2h,
                                   b_ih, b_hh):
    """Single-step forward() of MaskedRecurrentLayer (seq length 1)."""
    out = masked_rnn_unfold(x[None], hx, w_ih, w_hh, mask_i2h, mask_h2h,
                            b_ih, b_hh)
    return out[0]


def reference_forward(x, hx, w_ih, w_hh, mask_i2h, mask_h2h, b_ih, b_hh):
    igate = x @ (w_ih * mask_i2h.astype(w_ih.dtype)).T + b_ih
    hgate = hx @ (w_hh * mask_h2h.astype(w_hh.dtype)).T + b_hh
    return jnp.tanh(igate + hgate)


if __name__ == "__main__":
    # Module shapes implied by forward(): 2-D (batch, feature) inputs.
    batch = 8
    seq = 8
    input_size = 16
    hidden_size = 32

    key = jax.random.PRNGKey(0)
    k_x, k_h, k_wih, k_whh, k_bih, k_bhh = jax.random.split(key, 6)

    # Deterministic parameter init mirroring reset_parameters():
    # uniform(-stdv, stdv) with stdv = 1/sqrt(hidden_size).
    stdv = 1.0 / math.sqrt(hidden_size)
    u = functools.partial(jax.random.uniform, minval=-stdv, maxval=stdv,
                          dtype=jnp.float32)
    w_ih = u(k_wih, (hidden_size, input_size))
    w_hh = u(k_whh, (hidden_size, hidden_size))
    b_ih = u(k_bih, (hidden_size,))
    b_hh = u(k_bhh, (hidden_size,))
    # Registered buffers: all-ones boolean masks (default, i.e. unmasked).
    mask_i2h = jnp.ones((hidden_size, input_size), dtype=jnp.bool_)
    mask_h2h = jnp.ones((hidden_size, hidden_size), dtype=jnp.bool_)

    x_seq = jax.random.normal(k_x, (seq, batch, input_size), dtype=jnp.float32)
    hx0 = jax.random.normal(k_h, (batch, hidden_size), dtype=jnp.float32)

    params = (w_ih, w_hh, mask_i2h, mask_h2h, b_ih, b_hh)

    # Single-step forward (the module's forward()).
    out = masked_recurrent_layer_forward(x_seq[0], hx0, *params)
    out = jax.block_until_ready(out)
    ref = reference_forward(x_seq[0], hx0, *params)
    assert jnp.allclose(out, ref, atol=1e-5, rtol=1e-5), "forward mismatch"

    # Fused multi-step unfold(): one pallas_call for the whole sequence.
    outs = jax.block_until_ready(masked_rnn_unfold(x_seq, hx0, *params))
    h_ref = hx0
    for t in range(seq):
        h_ref = reference_forward(x_seq[t], h_ref, *params)
        assert jnp.allclose(outs[t], h_ref, atol=1e-5, rtol=1e-5), \
            f"unfold mismatch at t={t}"

    # A non-trivial mask to exercise the masked path as well.
    key_m = jax.random.PRNGKey(1)
    m_i2h = jax.random.bernoulli(key_m, 0.5, (hidden_size, input_size))
    m_h2h = jax.random.bernoulli(jax.random.fold_in(key_m, 1), 0.5,
                                 (hidden_size, hidden_size))
    params_m = (w_ih, w_hh, m_i2h, m_h2h, b_ih, b_hh)
    out_m = jax.block_until_ready(
        masked_recurrent_layer_forward(x_seq[0], hx0, *params_m))
    ref_m = reference_forward(x_seq[0], hx0, *params_m)
    assert jnp.allclose(out_m, ref_m, atol=1e-5, rtol=1e-5), "masked mismatch"

    print("KERNEL_OK")
</pallas_src>

<mosaic_0001>
module attributes {stable_mosaic.version = 11 : i64} {
  func.func @_fused_masked_rnn_kernel(%arg0: i32, %arg1: memref<8x128xf32, #tpu.memory_space<vmem>>, %arg2: memref<1x8x128xf32, #tpu.memory_space<vmem>>, %arg3: memref<128x128xf32, #tpu.memory_space<vmem>>, %arg4: memref<128x128xf32, #tpu.memory_space<vmem>>, %arg5: memref<1x128xf32, #tpu.memory_space<vmem>>, %arg6: memref<1x8x128xf32, #tpu.memory_space<vmem>>, %arg7: memref<8x128xf32, #tpu.memory_space<vmem>>) attributes {dimension_semantics = [#tpu.dimension_semantics<arbitrary>], iteration_bounds = array<i64: 1>, scalar_prefetch = 0 : i64, scratch_operands = 1 : i64, tpu.core_type = #tpu.core_type<tc>, window_params = [{pipeline_mode = #tpu.pipeline_mode<synchronous>, transform_indices = @transform_0, window_bounds = array<i64: 8, 128>}, {transform_indices = @transform_1, window_bounds = array<i64: 1, 8, 128>}, {pipeline_mode = #tpu.pipeline_mode<synchronous>, transform_indices = @transform_2, window_bounds = array<i64: 128, 128>}, {pipeline_mode = #tpu.pipeline_mode<synchronous>, transform_indices = @transform_3, window_bounds = array<i64: 128, 128>}, {pipeline_mode = #tpu.pipeline_mode<synchronous>, transform_indices = @transform_4, window_bounds = array<i64: 1, 128>}, {transform_indices = @transform_5, window_bounds = array<i64: 1, 8, 128>}]} {
    %c0_i32 = arith.constant 0 : i32
    %0 = arith.cmpi eq, %arg0, %c0_i32 : i32
    %1 = arith.extui %0 : i1 to i32
    %c0_i32_0 = arith.constant 0 : i32
    %2 = arith.cmpi ne, %1, %c0_i32_0 : i32
    scf.if %2 {
      %c0_17 = arith.constant 0 : index
      %c0_18 = arith.constant 0 : index
      %19 = vector.load %arg1[%c0_17, %c0_18] : memref<8x128xf32, #tpu.memory_space<vmem>>, vector<8x128xf32>
      %c0_19 = arith.constant 0 : index
      %c0_20 = arith.constant 0 : index
      %20 = vector.load %arg7[%c0_19, %c0_20] : memref<8x128xf32, #tpu.memory_space<vmem>>, vector<8x128xf32>
      tpu.vector_store %arg7[%c0_19, %c0_20], %19 {strides = array<i32>} : memref<8x128xf32, #tpu.memory_space<vmem>>, vector<8x128xf32>,
    } else {
    }
    %c0 = arith.constant 0 : index
    %c0_1 = arith.constant 0 : index
    %c0_2 = arith.constant 0 : index
    %3 = vector.load %arg2[%c0, %c0_1, %c0_2] : memref<1x8x128xf32, #tpu.memory_space<vmem>>, vector<1x8x128xf32>
    %4 = vector.shape_cast %3 : vector<1x8x128xf32> to vector<8x128xf32>
    %c0_3 = arith.constant 0 : index
    %c0_4 = arith.constant 0 : index
    %5 = vector.load %arg3[%c0_3, %c0_4] : memref<128x128xf32, #tpu.memory_space<vmem>>, vector<128x128xf32>
    %cst = arith.constant dense<0.000000e+00> : vector<8x128xf32>
    %6 = tpu.matmul %4, %5, %cst {dimension_numbers = #tpu.dot_dimension_numbers<[1], [0], [0], [1], [0, 0, 1, 1], [], []>} : vector<8x128xf32>, vector<128x128xf32>, vector<8x128xf32> -> vector<8x128xf32>
    %c0_5 = arith.constant 0 : index
    %c0_6 = arith.constant 0 : index
    %7 = vector.load %arg7[%c0_5, %c0_6] : memref<8x128xf32, #tpu.memory_space<vmem>>, vector<8x128xf32>
    %c0_7 = arith.constant 0 : index
    %c0_8 = arith.constant 0 : index
    %8 = vector.load %arg4[%c0_7, %c0_8] : memref<128x128xf32, #tpu.memory_space<vmem>>, vector<128x128xf32>
    %cst_9 = arith.constant dense<0.000000e+00> : vector<8x128xf32>
    %9 = tpu.matmul %7, %8, %cst_9 {dimension_numbers = #tpu.dot_dimension_numbers<[1], [0], [0], [1], [0, 0, 1, 1], [], []>} : vector<8x128xf32>, vector<128x128xf32>, vector<8x128xf32> -> vector<8x128xf32>
    %10 = arith.addf %6, %9 : vector<8x128xf32>
    %c0_10 = arith.constant 0 : index
    %c0_11 = arith.constant 0 : index
    %11 = vector.load %arg5[%c0_10, %c0_11] : memref<1x128xf32, #tpu.memory_space<vmem>>, vector<1x128xf32>
    %12 = vector.broadcast %11 : vector<1x128xf32> to vector<8x128xf32>
    %13 = arith.addf %10, %12 : vector<8x128xf32>
    %14 = math.tanh %13 : vector<8x128xf32>
    %c0_12 = arith.constant 0 : index
    %c0_13 = arith.constant 0 : index
    %15 = vector.load %arg7[%c0_12, %c0_13] : memref<8x128xf32, #tpu.memory_space<vmem>>, vector<8x128xf32>
    tpu.vector_store %arg7[%c0_12, %c0_13], %14 {strides = array<i32>} : memref<8x128xf32, #tpu.memory_space<vmem>>, vector<8x128xf32>,
    %c0_14 = arith.constant 0 : index
    %c0_15 = arith.constant 0 : index
    %c0_16 = arith.constant 0 : index
    %16 = vector.load %arg6[%c0_14, %c0_15, %c0_16] : memref<1x8x128xf32, #tpu.memory_space<vmem>>, vector<1x8x128xf32>
    %17 = vector.shape_cast %16 : vector<1x8x128xf32> to vector<8x128xf32>
    %18 = vector.shape_cast %14 : vector<8x128xf32> to vector<1x8x128xf32>
    tpu.vector_store %arg6[%c0_14, %c0_15, %c0_16], %18 {strides = array<i32>} : memref<1x8x128xf32, #tpu.memory_space<vmem>>, vector<1x8x128xf32>,
    return
  }
  func.func @transform_0(%arg0: i32) -> (i32, i32) {
    %c0_i32 = arith.constant 0 : i32
    %c0_i32_0 = arith.constant 0 : i32
    %c0_i32_1 = arith.constant 0 : i32
    return %c0_i32, %c0_i32_0 : i32, i32
  }
  func.func @transform_1(%arg0: i32) -> (i32, i32, i32) {
    %c0_i32 = arith.constant 0 : i32
    %c0_i32_0 = arith.constant 0 : i32
    %c0_i32_1 = arith.constant 0 : i32
    return %arg0, %c0_i32, %c0_i32_0 : i32, i32, i32
  }
  func.func @transform_2(%arg0: i32) -> (i32, i32) {
    %c0_i32 = arith.constant 0 : i32
    %c0_i32_0 = arith.constant 0 : i32
    %c0_i32_1 = arith.constant 0 : i32
    return %c0_i32, %c0_i32_0 : i32, i32
  }
  func.func @transform_3(%arg0: i32) -> (i32, i32) {
    %c0_i32 = arith.constant 0 : i32
    %c0_i32_0 = arith.constant 0 : i32
    %c0_i32_1 = arith.constant 0 : i32
    return %c0_i32, %c0_i32_0 : i32, i32
  }
  func.func @transform_4(%arg0: i32) -> (i32, i32) {
    %c0_i32 = arith.constant 0 : i32
    %c0_i32_0 = arith.constant 0 : i32
    %c0_i32_1 = arith.constant 0 : i32
    return %c0_i32, %c0_i32_0 : i32, i32
  }
  func.func @transform_5(%arg0: i32) -> (i32, i32, i32) {
    %c0_i32 = arith.constant 0 : i32
    %c0_i32_0 = arith.constant 0 : i32
    %c0_i32_1 = arith.constant 0 : i32
    return %arg0, %c0_i32, %c0_i32_0 : i32, i32, i32
  }
}

</mosaic_0001>

<bundles_post_ra>
// kernel: tpu_custom_call.1
= control target key start
LH: loop header
LB: loop body
LE: loop exit
PB: predicated region body
PF: predicated region fallthrough
CT: control target
= control target key end

     0   :  { %10 = vsyncpa [#allocation4], 0  ;;  %s682_s0 = inlined_call_operand.hbm [shape: f32[8,128], index: 0, kind: input, shape index: {}]   ;;  %s683_s1 = inlined_call_operand.hbm [shape: f32[1,8,128], index: 1, kind: input, shape index: {}]   ;;  %s684_s2 = inlined_call_operand.hbm [shape: f32[128,128], index: 2, kind: input, shape index: {}]   ;;  %s685_s3 = inlined_call_operand.hbm [shape: f32[128,128], index: 3, kind: input, shape index: {}]   ;;  %s686_s4 = inlined_call_operand.vmem [shape: f32[1,128], index: 4, kind: input, shape index: {}]   ;;  %s687_s5 = inlined_call_operand.hbm [shape: f32[1,8,128], index: 5, kind: output, shape index: {}]  }
   0x1   :  { %11 = vsyncpa [#allocation7], 0 }
   0x2   :  { %12 = vsyncpa [#allocation10], 0 }
   0x3   :  { %13 = vsyncpa [#allocation5], 0  ;;  %s563_s18 = smov [#allocation6]   ;;  %s564_s20 = smov [#allocation3]  }
   0x4   :  { %s30_s19 = sshll.u32 %s563_s18, 4  ;;  %s20_s21 = sshll.u32 %s564_s20, 4  ;;  %s31_s19 = int_to_ptr.vmem [resolvable:$true] %s30_s19  ;;  %s21_s21 = int_to_ptr.vmem [resolvable:$true] %s20_s21 }
   0x5   :  { %s445_s24 = scalar_lea.hbm %s683_s1, 128 }
   0x6   :  { %p446_p0 = scmp.ne.s32.totalorder %s683_s1, %s445_s24  ;;  %p449_p1 = scmp.lt.u32.totalorder %s445_s24, %s683_s1 }
   0x8   :  { %p451_p2 = pnand %p449_p1, %p446_p0 }
   0xa   :  { %454 = shalt.err (!%p451_p2)
}
   0xb   :  { %s455_s29 = scalar_lea.vmem %s31_s19, 128  ;;  %p460_p4 = scmp.lt.s32.totalorder %s31_s19, %s31_s19 }
   0xc   :  { %p456_p3 = scmp.ne.s32.totalorder %s31_s19, %s455_s29  ;;  %p461_p5 = scmp.lt.s32.totalorder %s455_s29, %s455_s29 }
   0xe   :  { %p462_p6 = por %p461_p5, %p460_p4 }
  0x10   :  { %p463_p7 = pnand %p462_p6, %p456_p3 }
  0x12   :  { %466 = shalt.err (!%p463_p7)
}
  0x13   :  { %33 = dma.hbm_to_vmem [thread:$0]  %s683_s1, 128, %s31_s19, [#allocation7]  }
  0x14   :  { %s467_s9 = scalar_lea.hbm %s682_s0, 128 }
  0x15   :  { %p468_p8 = scmp.ne.s32.totalorder %s682_s0, %s467_s9  ;;  %p471_p9 = scmp.lt.u32.totalorder %s467_s9, %s682_s0 }
  0x17   :  { %p473_p10 = pnand %p471_p9, %p468_p8 }
  0x19   :  { %476 = shalt.err (!%p473_p10)
}
  0x1a   :  { %s477_s14 = scalar_lea.vmem %s21_s21, 128  ;;  %p482_p12 = scmp.lt.s32.totalorder %s21_s21, %s21_s21 }
  0x1b   :  { %p478_p11 = scmp.ne.s32.totalorder %s21_s21, %s477_s14  ;;  %p483_p13 = scmp.lt.s32.totalorder %s477_s14, %s477_s14 }
  0x1d   :  { %p484_p0 = por %p483_p13, %p482_p12 }
  0x1f   :  { %p485_p1 = pnand %p484_p0, %p478_p11 }
  0x21   :  { %488 = shalt.err (!%p485_p1)
}
  0x22   :  { %23 = dma.hbm_to_vmem [thread:$0]  %s682_s0, 128, %s21_s21, [#allocation4]  }
  0x23   :  { %s565_s16 = smov [#allocation8]   ;;  %s489_s20 = scalar_lea.hbm %s684_s2, 2048 }
  0x24   :  { %s39_s17 = sshll.u32 %s565_s16, 4  ;;  %p490_p2 = scmp.ne.s32.totalorder %s684_s2, %s489_s20  ;;  %s40_s17 = int_to_ptr.vmem [resolvable:$true] %s39_s17 }
  0x25   :  { %p493_p3 = scmp.lt.u32.totalorder %s489_s20, %s684_s2 }
  0x27   :  { %p495_p4 = pnand %p493_p3, %p490_p2 }
  0x29   :  { %498 = shalt.err (!%p495_p4)
}
  0x2a   :  { %s499_s26 = scalar_lea.vmem %s40_s17, 2048  ;;  %p504_p6 = scmp.lt.s32.totalorder %s40_s17, %s40_s17 }
  0x2b   :  { %p500_p5 = scmp.ne.s32.totalorder %s40_s17, %s499_s26  ;;  %p505_p7 = scmp.lt.s32.totalorder %s499_s26, %s499_s26 }
  0x2d   :  { %p506_p8 = por %p505_p7, %p504_p6 }
  0x2f   :  { %p507_p9 = pnand %p506_p8, %p500_p5 }
  0x31   :  { %510 = shalt.err (!%p507_p9)
}
  0x32   :  { %s566_s0 = smov 128   ;;  %s567_s21 = smov 8  }
  0x33   :  { %45 = dma.hbm_to_vmem [thread:$0]  %s684_s2, 2048, %s40_s17, [#allocation7], %s566_s0, %s566_s0, %s567_s21  }
  0x34   :  { %s568_s29 = smov [#allocation9]   ;;  %s511_s8 = scalar_lea.hbm %s685_s3, 2048 }
  0x35   :  { %s51_s30 = sshll.u32 %s568_s29, 4  ;;  %p512_p10 = scmp.ne.s32.totalorder %s685_s3, %s511_s8  ;;  %s52_s30 = int_to_ptr.vmem [resolvable:$true] %s51_s30 }
  0x36   :  { %p515_p11 = scmp.lt.u32.totalorder %s511_s8, %s685_s3 }
  0x38   :  { %p517_p12 = pnand %p515_p11, %p512_p10 }
  0x3a   :  { %520 = shalt.err (!%p517_p12)
}
  0x3b   :  { %s521_s13 = scalar_lea.vmem %s52_s30, 2048  ;;  %p526_p0 = scmp.lt.s32.totalorder %s52_s30, %s52_s30 }
  0x3c   :  { %p522_p13 = scmp.ne.s32.totalorder %s52_s30, %s521_s13  ;;  %p527_p1 = scmp.lt.s32.totalorder %s521_s13, %s521_s13 }
  0x3e   :  { %p528_p2 = por %p527_p1, %p526_p0 }
  0x40   :  { %p529_p3 = pnand %p528_p2, %p522_p13 }
  0x42   :  { %532 = shalt.err (!%p529_p3)
}
  0x43   :  { %57 = dma.hbm_to_vmem [thread:$0]  %s685_s3, 2048, %s52_s30, [#allocation10], %s566_s0, %s566_s0, %s567_s21  }
  0x44   :  { %555 = dma.done.wait [#allocation4], 128  }
  0x45   :  { %556 = vsyncadd [#allocation4], 4294967168 }
  0x46   :  { %557 = dma.done.wait [#allocation7], 2176  }
  0x47   :  { %558 = vsyncadd [#allocation7], 4294965120 }
  0x48   :  { %559 = dma.done.wait [#allocation10], 2048  }
  0x49   :  { %560 = vsyncadd [#allocation10], 4294965248  ;;  %v569_v0 = vmov 0.0|0.0   ;;  %vm570_vm0 = vmmov 0   ;;  %v571_v1 = vmov 0.0   ;;  %v96_v2 = vld [vmem:[#allocation9] sm:$0xff] }
  0x4a   :  { %385 = vmatprep.subr.bf16.mxu0 %v569_v0  ;;  %409 = vmatprep.subr.bf16.mxu1 %v569_v0  ;;  %v97_v3 = vld [vmem:[#allocation9 + $0x8] sm:$0xff]  ;;  %v79_v4 = vld [vmem:[#allocation8] sm:$0xff]  ;;  %v98_v7 = vld [vmem:[#allocation9 + $0x10] sm:$0xff]  ;;  %s572_s15 = smov [#allocation11]  }
  0x4b   :  { %347 = vmatprep.mubr.msk.f32.mxu0 %vm570_vm0, %v571_v1  ;;  %382 = vmatprep.mubr.msk.f32.mxu1 %vm570_vm0, %v571_v1  ;;  %v386_v5 = vpack.c.bf16 %v97_v3, %v96_v2  ;;  %v80_v6 = vld [vmem:[#allocation8 + $0x8] sm:$0xff]  ;;  %v99_v8 = vld [vmem:[#allocation9 + $0x18] sm:$0xff]  ;;  %v81_v10 = vld [vmem:[#allocation8 + $0x10] sm:$0xff]  ;;  %s269_s16 = sshll.u32 %s572_s15, 4  ;;  %s270_s16 = int_to_ptr.vmem [resolvable:$true] %s269_s16 }
  0x4c   :  { %v410_v9 = vpack.c.bf16 %v80_v6, %v79_v4  ;;  %v82_v11 = vld [vmem:[#allocation8 + $0x18] sm:$0xff]  ;;  %v389_v12 = vpack.c.bf16 %v99_v8, %v98_v7  ;;  %v100_v14 = vld [vmem:[#allocation9 + $0x20] sm:$0xff]  ;;  %v101_v15 = vld [vmem:[#allocation9 + $0x28] sm:$0xff]  ;;  %s533_s17 = scalar_lea.vmem %s270_s16, 128  ;;  %p538_p5 = scmp.lt.s32.totalorder %s270_s16, %s270_s16 }
  0x4d   :  { %387 = vmatpush3.bf16.msra.mxu0 %v386_v5  ;;  %v413_v13 = vpack.c.bf16 %v82_v11, %v81_v10  ;;  %v83_v16 = vld [vmem:[#allocation8 + $0x20] sm:$0xff]  ;;  %v84_v17 = vld [vmem:[#allocation8 + $0x28] sm:$0xff]  ;;  %v392_v18 = vpack.c.bf16 %v101_v15, %v100_v14  ;;  %v102_v20 = vld [vmem:[#allocation9 + $0x30] sm:$0xff]  ;;  %p534_p4 = scmp.ne.s32.totalorder %s270_s16, %s533_s17  ;;  %p539_p6 = scmp.lt.s32.totalorder %s533_s17, %s533_s17 }
  0x4e   :  { %411 = vmatpush3.bf16.msra.mxu1 %v410_v9  ;;  %388 = vmatprep.subr.bf16.mxu0 %v569_v0  ;;  %v416_v19 = vpack.c.bf16 %v84_v17, %v83_v16  ;;  %v103_v21 = vld [vmem:[#allocation9 + $0x38] sm:$0xff]  ;;  %v85_v22 = vld [vmem:[#allocation8 + $0x30] sm:$0xff]  ;;  %v104_v26 = vld [vmem:[#allocation9 + $0x40] sm:$0xff] }
  0x4f   :  { %412 = vmatprep.subr.bf16.mxu1 %v569_v0  ;;  %v86_v23 = vld [vmem:[#allocation8 + $0x38] sm:$0xff]  ;;  %v395_v24 = vpack.c.bf16 %v103_v21, %v102_v20  ;;  %v105_v27 = vld [vmem:[#allocation9 + $0x48] sm:$0xff]  ;;  %v87_v28 = vld [vmem:[#allocation8 + $0x40] sm:$0xff]  ;;  %p540_p7 = por %p539_p6, %p538_p5 }
  0x50   :  { %v419_v25 = vpack.c.bf16 %v86_v23, %v85_v22  ;;  %v88_v29 = vld [vmem:[#allocation8 + $0x48] sm:$0xff]  ;;  %v398_v30 = vpack.c.bf16 %v105_v27, %v104_v26  ;;  %v106_v32 = vld [vmem:[#allocation9 + $0x50] sm:$0xff]  ;;  %v107_v33 = vld [vmem:[#allocation9 + $0x58] sm:$0xff] }
  0x51   :  { %390 = vmatpush3.bf16.msra.mxu0 %v389_v12  ;;  %v422_v31 = vpack.c.bf16 %v88_v29, %v87_v28  ;;  %v89_v34 = vld [vmem:[#allocation8 + $0x50] sm:$0xff]  ;;  %v90_v35 = vld [vmem:[#allocation8 + $0x58] sm:$0xff]  ;;  %v401_v36 = vpack.c.bf16 %v107_v33, %v106_v32  ;;  %v108_v38 = vld [vmem:[#allocation9 + $0x60] sm:$0xff]  ;;  %p541_p8 = pnand %p540_p7, %p534_p4 }
  0x52   :  { %414 = vmatpush3.bf16.msra.mxu1 %v413_v13  ;;  %391 = vmatprep.subr.bf16.mxu0 %v569_v0  ;;  %v425_v37 = vpack.c.bf16 %v90_v35, %v89_v34  ;;  %v109_v39 = vld [vmem:[#allocation9 + $0x68] sm:$0xff]  ;;  %v91_v40 = vld [vmem:[#allocation8 + $0x60] sm:$0xff]  ;;  %v110_v44 = vld [vmem:[#allocation9 + $0x70] sm:$0xff] }
  0x53   :  { %415 = vmatprep.subr.bf16.mxu1 %v569_v0  ;;  %v92_v41 = vld [vmem:[#allocation8 + $0x68] sm:$0xff]  ;;  %v404_v42 = vpack.c.bf16 %v109_v39, %v108_v38  ;;  %v111_v45 = vld [vmem:[#allocation9 + $0x78] sm:$0xff]  ;;  %v93_v46 = vld [vmem:[#allocation8 + $0x70] sm:$0xff] }
  0x54   :  { %v428_v43 = vpack.c.bf16 %v92_v41, %v91_v40  ;;  %v94_v47 = vld [vmem:[#allocation8 + $0x78] sm:$0xff]  ;;  %v407_v48 = vpack.c.bf16 %v111_v45, %v110_v44  ;;  %v76_v50 = vld [vmem:[#allocation3] sm:$0xff] }
  0x55   :  { %393 = vmatpush3.bf16.msra.mxu0 %v392_v18  ;;  %v431_v49 = vpack.c.bf16 %v94_v47, %v93_v46  ;;  %v78_v51 = vld [vmem:[#allocation6] sm:$0xff]  ;;  %v280_v54 = vld [vmem:[%s686_s4] ss:$0 sm:$0xff] }
  0x56   :  { %417 = vmatpush3.bf16.msra.mxu1 %v416_v19  ;;  %394 = vmatprep.subr.bf16.mxu0 %v569_v0 }
  0x57   :  { %418 = vmatprep.subr.bf16.mxu1 %v569_v0 }
  0x59   :  { %396 = vmatpush3.bf16.msra.mxu0 %v395_v24 }
  0x5a   :  { %420 = vmatpush3.bf16.msra.mxu1 %v419_v25  ;;  %397 = vmatprep.subr.bf16.mxu0 %v569_v0 }
  0x5b   :  { %421 = vmatprep.subr.bf16.mxu1 %v569_v0 }
  0x5d   :  { %399 = vmatpush3.bf16.msra.mxu0 %v398_v30 }
  0x5e   :  { %423 = vmatpush3.bf16.msra.mxu1 %v422_v31  ;;  %400 = vmatprep.subr.bf16.mxu0 %v569_v0 }
  0x5f   :  { %424 = vmatprep.subr.bf16.mxu1 %v569_v0 }
  0x61   :  { %402 = vmatpush3.bf16.msra.mxu0 %v401_v36 }
  0x62   :  { %426 = vmatpush3.bf16.msra.mxu1 %v425_v37  ;;  %403 = vmatprep.subr.bf16.mxu0 %v569_v0 }
  0x63   :  { %427 = vmatprep.subr.bf16.mxu1 %v569_v0 }
  0x65   :  { %405 = vmatpush3.bf16.msra.mxu0 %v404_v42 }
  0x66   :  { %429 = vmatpush3.bf16.msra.mxu1 %v428_v43  ;;  %406 = vmatprep.subr.bf16.mxu0 %v569_v0 }
  0x67   :  { %430 = vmatprep.subr.bf16.mxu1 %v569_v0 }
  0x69   :  { %408 = vmatpush3.bf16.msra.mxu0 %v407_v48 }
  0x6a   :  { %432 = vmatpush3.bf16.msra.mxu1 %v431_v49 }
  0x6c   :  { %348 = vmatmul.mubr.f32.vlgmr.msra.gmra.mrb[0].mxu0 %v76_v50 }
  0x6d   :  { %383 = vmatmul.mubr.f32.vlgmr.msra.gmra.mrb[0].mxu1 %v78_v51 }
 0x13f   :  { %v178_v52 = vpop.f32.mrb[0].mxu0 }
 0x140   :  { %v248_v53 = vpop.f32.mrb[0].mxu1  ;;  %v349_v55 = vpop.f32.mrb[1].mxu0 }
 0x141   :  { %v249_v56 = vadd.f32 %v248_v53, %v178_v52  ;;  %v384_v57 = vpop.f32.mrb[1].mxu1 }
 0x143   :  { %v259_v58 = vadd.f32 %v280_v54, %v249_v56 }
 0x145   :  { %443 = vtanh.f32 %v259_v58 }
 0x14f   :  { %v444_v59 = vpop.eup %443 }
 0x150   :  { %262 = vst [vmem:[#allocation11] sm:$0xff] %v444_v59 }
 0x151   :  { %544 = shalt.err (!%p541_p8)
}
 0x152   :  { %s545_s4 = scalar_lea.hbm %s687_s5, 128 }
 0x153   :  { %p546_p9 = scmp.ne.s32.totalorder %s687_s5, %s545_s4  ;;  %p549_p10 = scmp.lt.u32.totalorder %s545_s4, %s687_s5 }
 0x155   :  { %p551_p11 = pnand %p549_p10, %p546_p9 }
 0x157   :  { %554 = shalt.err (!%p551_p11)
}
 0x158   :  { %272 = dma.vmem_to_hbm [thread:$0]  %s270_s16, 128, %s687_s5, [#allocation5]  }
 0x159   :  { %561 = dma.done.wait [#allocation5], 128  }
 0x15a   :  { %562 = vsyncadd [#allocation5], 4294967168 }
 0x15b   :  { %276 = vsyncpa [#allocation4], 1 }
 0x15c   :  { %277 = vsyncpa [#allocation7], 1 }
 0x15d   :  { %278 = vsyncpa [#allocation10], 1 }
 0x15e   :  { %279 = vsyncpa [#allocation5], 1 }

</bundles_post_ra>
